<compile_context>
chip_gen: v6e
topology: v6e:2x2x1
jax: 0.10.0
libtpu: 0.0.40
codegen_flags: <defaults>
</compile_context>

<pallas_src>
import jax
import jax.numpy as jnp
from jax.experimental import pallas as pl
from jax.experimental.pallas import tpu as pltpu

BN_EPS = 1e-5
C = 3  # fixed by Conv2d(3, 3, 1)


def _round_up(a, b):
    return ((a + b - 1) // b) * b


def _stats_kernel(p_ref, x_ref, acc_ref):
    # p_ref:  SMEM (C*C + C,) f32  = [W1 row-major, b1]
    # x_ref:  VMEM (C, T)   f32    channel-major, lane-dense pixel tile
    # acc_ref: VMEM (2*C, 1) f32   accumulator: [per-channel sum ; sum of squares]
    @pl.when(pl.program_id(0) == 0)
    def _():
        acc_ref[...] = jnp.zeros_like(acc_ref)

    xr = jnp.maximum(x_ref[...], 0.0)                     # relu(x)

    # v = W1 @ xr + b1  -> 9 scalar*vector FMAs on the VPU (MXU never fits C=3)
    rows = []
    for j in range(C):
        r = xr[0:1, :] * p_ref[j * C + 0]
        for i in range(1, C):
            r = r + xr[i:i + 1, :] * p_ref[j * C + i]
        r = r + p_ref[C * C + j]
        rows.append(r)
    v = jnp.concatenate(rows, axis=0)                     # (C, T)

    s1 = jnp.sum(v, axis=1, keepdims=True)                # (C, 1)
    s2 = jnp.sum(v * v, axis=1, keepdims=True)            # (C, 1)
    acc_ref[...] += jnp.concatenate([s1, s2], axis=0)


def _apply_kernel(p_ref, x_ref, o_ref):
    # p_ref: SMEM (2*(C*C + C),) f32 = [A row-major, d, W2 row-major, b2]
    # out = W2 @ relu(A @ relu(x) + d) + b2
    xr = jnp.maximum(x_ref[...], 0.0)                     # relu(x)

    t_rows = []
    for j in range(C):
        r = xr[0:1, :] * p_ref[j * C + 0]
        for i in range(1, C):
            r = r + xr[i:i + 1, :] * p_ref[j * C + i]
        r = r + p_ref[C * C + j]
        t_rows.append(jnp.maximum(r, 0.0))                # relu(v2)

    off = C * C + C
    out_rows = []
    for j in range(C):
        r = t_rows[0] * p_ref[off + j * C + 0]
        for i in range(1, C):
            r = r + t_rows[i] * p_ref[off + j * C + i]
        r = r + p_ref[off + C * C + j]
        out_rows.append(r)

    o_ref[...] = jnp.concatenate(out_rows, axis=0).astype(o_ref.dtype)


def model_forward(x_nchw, w1, b1, w2, b2, *, max_tile=8192):
    """x_nchw: (N, 3, H, W) f32.  w1/w2: (Cout, Cin) 1x1 conv weights, b1/b2: (C,)."""
    N, c_in, H, W = x_nchw.shape
    assert c_in == C
    P = N * H * W

    # NCHW -> channel-major, lane-dense (C, P)
    x_cp = jnp.transpose(x_nchw, (1, 0, 2, 3)).reshape(C, P)

    # Pad the pixel axis to a multiple of the (128-aligned) tile size.
    p_lane = _round_up(P, 128)
    if p_lane <= max_tile:
        tile = p_lane
        p_pad = p_lane
    else:
        tile = max_tile
        p_pad = _round_up(P, tile)
    n_pad = p_pad - P
    if n_pad:
        x_cp = jnp.pad(x_cp, ((0, 0), (0, n_pad)))
    grid = (p_pad // tile,)

    smem_spec = pl.BlockSpec(memory_space=pltpu.MemorySpace.SMEM)
    x_spec = pl.BlockSpec((C, tile), lambda i: (0, i))

    # ---------- pass 1: BN statistics of v = conv(relu(x)) + b1 ----------
    params1 = jnp.concatenate([w1.reshape(-1), b1]).astype(jnp.float32)
    stats = pl.pallas_call(
        _stats_kernel,
        out_shape=jax.ShapeDtypeStruct((2 * C, 1), jnp.float32),
        grid=grid,
        in_specs=[smem_spec, x_spec],
        out_specs=pl.BlockSpec((2 * C, 1), lambda i: (0, 0)),
        compiler_params=pltpu.CompilerParams(
            dimension_semantics=("arbitrary",),       # accumulator across tiles
            vmem_limit_bytes=32 * 1024 * 1024),
        cost_estimate=pl.CostEstimate(
            flops=30 * p_pad, transcendentals=0,
            bytes_accessed=4 * C * p_pad),
    )(params1, x_cp)

    # Padded (zero) pixels contribute exactly v = b1; remove their contribution.
    s_sum = stats[:C, 0] - n_pad * b1
    s_sq = stats[C:, 0] - n_pad * b1 * b1
    mean = s_sum / P
    var = jnp.maximum(s_sq / P - mean * mean, 0.0)        # biased var (training BN)
    inv = jax.lax.rsqrt(var + BN_EPS)

    # Fold BN affine + the two back-to-back conv1 calls into one 3x3 transform:
    #   v0 = inv*(v - mean) + 1
    #   v2 = W2 @ (W2 @ v0 + b2) + b2 = W22 @ v0 + b22
    #   v2 = A @ relu(x) + d   with  A = W22 @ diag(inv) @ W1
    w22 = w2 @ w2
    b22 = w2 @ b2 + b2
    A = w22 @ (inv[:, None] * w1)
    d = w22 @ (inv * b1 + 1.0 - mean * inv) + b22

    params2 = jnp.concatenate(
        [A.reshape(-1), d, w2.reshape(-1), b2]).astype(jnp.float32)

    # ---------- pass 2: apply fused transform, relu, final conv ----------
    out_cp = pl.pallas_call(
        _apply_kernel,
        out_shape=jax.ShapeDtypeStruct((C, p_pad), jnp.float32),
        grid=grid,
        in_specs=[smem_spec, x_spec],
        out_specs=pl.BlockSpec((C, tile), lambda i: (0, i)),
        compiler_params=pltpu.CompilerParams(
            dimension_semantics=("parallel",),        # independent pixel tiles
            vmem_limit_bytes=32 * 1024 * 1024),
        cost_estimate=pl.CostEstimate(
            flops=40 * p_pad, transcendentals=0,
            bytes_accessed=8 * C * p_pad),
    )(params2, x_cp)

    out_cp = out_cp[:, :P]
    return jnp.transpose(out_cp.reshape(C, N, H, W), (1, 0, 2, 3))


def _ref_forward(x_nchw, w1, b1, w2, b2):
    """Pure-JAX reference for correctness."""
    x = jnp.maximum(x_nchw, 0.0)

    def conv1x1(inp, w, b):
        return jnp.einsum("nchw,oc->nohw", inp, w) + b[None, :, None, None]

    v = conv1x1(x, w1, b1)
    mean = jnp.mean(v, axis=(0, 2, 3), keepdims=True)
    var = jnp.mean((v - mean) ** 2, axis=(0, 2, 3), keepdims=True)
    v0 = (v - mean) * jax.lax.rsqrt(var + BN_EPS) + 1.0
    v1 = conv1x1(v0, w2, b2)
    v2 = conv1x1(v1, w2, b2)
    v3 = jnp.maximum(v2, 0.0)
    v4 = conv1x1(v3, w2, b2)
    return v4


if __name__ == "__main__":
    key = jax.random.PRNGKey(0)
    k_x, k_w1, k_b1, k_w2, k_b2 = jax.random.split(key, 5)

    bound = 1.0 / jnp.sqrt(jnp.float32(C))  # fan_in = C * 1 * 1
    w1 = jax.random.uniform(k_w1, (C, C), jnp.float32, -bound, bound)
    b1 = jax.random.uniform(k_b1, (C,), jnp.float32, -bound, bound)
    w2 = jax.random.uniform(k_w2, (C, C), jnp.float32, -bound, bound)
    b2 = jax.random.uniform(k_b2, (C,), jnp.float32, -bound, bound)

    # Case 1: multi-tile path (small tile forces a 4-step grid: tiling,
    # pipelined DMA, stats accumulation, parallel apply pass all exercised).
    x1 = jax.random.normal(k_x, (2, C, 16, 16), dtype=jnp.float32)
    out1 = jax.block_until_ready(model_forward(x1, w1, b1, w2, b2, max_tile=128))
    ref1 = _ref_forward(x1, w1, b1, w2, b2)
    assert out1.shape == x1.shape
    assert jnp.allclose(out1, ref1, atol=1e-4, rtol=1e-4), "mismatch (tiled case)"

    # Case 2: the original module's shape (1, 3, 3, 3) — exercises the
    # lane-padding path and the padded-pixel correction of the BN stats.
    x2 = jax.random.normal(jax.random.PRNGKey(1), (1, C, 3, 3), dtype=jnp.float32)
    out2 = jax.block_until_ready(model_forward(x2, w1, b1, w2, b2))
    ref2 = _ref_forward(x2, w1, b1, w2, b2)
    assert out2.shape == x2.shape
    assert jnp.allclose(out2, ref2, atol=1e-4, rtol=1e-4), "mismatch (padded case)"

    print("KERNEL_OK")
</pallas_src>

<mosaic_0001>
module attributes {stable_mosaic.version = 11 : i64} {
  func.func @_stats_kernel(%arg0: i32, %arg1: memref<12xf32, #tpu.memory_space<smem>>, %arg2: memref<3x128xf32, #tpu.memory_space<vmem>>, %arg3: memref<6x1xf32, #tpu.memory_space<vmem>>) attributes {dimension_semantics = [#tpu.dimension_semantics<arbitrary>], iteration_bounds = array<i64: 4>, scalar_prefetch = 0 : i64, scratch_operands = 0 : i64, tpu.core_type = #tpu.core_type<tc>, window_params = [{transform_indices = @transform_0, window_bounds = array<i64: 12>}, {transform_indices = @transform_1, window_bounds = array<i64: 3, 128>}, {pipeline_mode = #tpu.pipeline_mode<synchronous>, transform_indices = @transform_2, window_bounds = array<i64: 6, 1>}]} {
    %c0_i32 = arith.constant 0 : i32
    %0 = arith.cmpi eq, %arg0, %c0_i32 : i32
    %1 = arith.extui %0 : i1 to i32
    %c0_i32_0 = arith.constant 0 : i32
    %2 = arith.cmpi ne, %1, %c0_i32_0 : i32
    scf.if %2 {
      %cst_9 = arith.constant 0.000000e+00 : f32
      %67 = vector.broadcast %cst_9 : f32 to vector<6x1xf32>
      %c0_10 = arith.constant 0 : index
      %c0_11 = arith.constant 0 : index
      %68 = vector.load %arg3[%c0_10, %c0_11] : memref<6x1xf32, #tpu.memory_space<vmem>>, vector<6x1xf32>
      tpu.vector_store %arg3[%c0_10, %c0_11], %67 {strides = array<i32>} : memref<6x1xf32, #tpu.memory_space<vmem>>, vector<6x1xf32>,
    } else {
    }
    %c0 = arith.constant 0 : index
    %c0_1 = arith.constant 0 : index
    %3 = vector.load %arg2[%c0, %c0_1] : memref<3x128xf32, #tpu.memory_space<vmem>>, vector<3x128xf32>
    %cst = arith.constant 0.000000e+00 : f32
    %4 = vector.broadcast %cst : f32 to vector<3x128xf32>
    %5 = arith.maximumf %3, %4 : vector<3x128xf32>
    %6 = vector.extract_strided_slice %5 {offsets = [0, 0], sizes = [1, 128], strides = [1, 1]} : vector<3x128xf32> to vector<1x128xf32>
    %c0_2 = arith.constant 0 : index
    %7 = memref.load %arg1[%c0_2] : memref<12xf32, #tpu.memory_space<smem>>
    %8 = vector.broadcast %7 : f32 to vector<1x128xf32>
    %9 = arith.mulf %6, %8 : vector<1x128xf32>
    %10 = vector.extract_strided_slice %5 {offsets = [1, 0], sizes = [1, 128], strides = [1, 1]} : vector<3x128xf32> to vector<1x128xf32>
    %c1 = arith.constant 1 : index
    %11 = memref.load %arg1[%c1] : memref<12xf32, #tpu.memory_space<smem>>
    %12 = vector.broadcast %11 : f32 to vector<1x128xf32>
    %13 = arith.mulf %10, %12 : vector<1x128xf32>
    %14 = arith.addf %9, %13 : vector<1x128xf32>
    %15 = vector.extract_strided_slice %5 {offsets = [2, 0], sizes = [1, 128], strides = [1, 1]} : vector<3x128xf32> to vector<1x128xf32>
    %c2 = arith.constant 2 : index
    %16 = memref.load %arg1[%c2] : memref<12xf32, #tpu.memory_space<smem>>
    %17 = vector.broadcast %16 : f32 to vector<1x128xf32>
    %18 = arith.mulf %15, %17 : vector<1x128xf32>
    %19 = arith.addf %14, %18 : vector<1x128xf32>
    %c9 = arith.constant 9 : index
    %20 = memref.load %arg1[%c9] : memref<12xf32, #tpu.memory_space<smem>>
    %21 = vector.broadcast %20 : f32 to vector<1x128xf32>
    %22 = arith.addf %19, %21 : vector<1x128xf32>
    %23 = vector.extract_strided_slice %5 {offsets = [0, 0], sizes = [1, 128], strides = [1, 1]} : vector<3x128xf32> to vector<1x128xf32>
    %c3 = arith.constant 3 : index
    %24 = memref.load %arg1[%c3] : memref<12xf32, #tpu.memory_space<smem>>
    %25 = vector.broadcast %24 : f32 to vector<1x128xf32>
    %26 = arith.mulf %23, %25 : vector<1x128xf32>
    %27 = vector.extract_strided_slice %5 {offsets = [1, 0], sizes = [1, 128], strides = [1, 1]} : vector<3x128xf32> to vector<1x128xf32>
    %c4 = arith.constant 4 : index
    %28 = memref.load %arg1[%c4] : memref<12xf32, #tpu.memory_space<smem>>
    %29 = vector.broadcast %28 : f32 to vector<1x128xf32>
    %30 = arith.mulf %27, %29 : vector<1x128xf32>
    %31 = arith.addf %26, %30 : vector<1x128xf32>
    %32 = vector.extract_strided_slice %5 {offsets = [2, 0], sizes = [1, 128], strides = [1, 1]} : vector<3x128xf32> to vector<1x128xf32>
    %c5 = arith.constant 5 : index
    %33 = memref.load %arg1[%c5] : memref<12xf32, #tpu.memory_space<smem>>
    %34 = vector.broadcast %33 : f32 to vector<1x128xf32>
    %35 = arith.mulf %32, %34 : vector<1x128xf32>
    %36 = arith.addf %31, %35 : vector<1x128xf32>
    %c10 = arith.constant 10 : index
    %37 = memref.load %arg1[%c10] : memref<12xf32, #tpu.memory_space<smem>>
    %38 = vector.broadcast %37 : f32 to vector<1x128xf32>
    %39 = arith.addf %36, %38 : vector<1x128xf32>
    %40 = vector.extract_strided_slice %5 {offsets = [0, 0], sizes = [1, 128], strides = [1, 1]} : vector<3x128xf32> to vector<1x128xf32>
    %c6 = arith.constant 6 : index
    %41 = memref.load %arg1[%c6] : memref<12xf32, #tpu.memory_space<smem>>
    %42 = vector.broadcast %41 : f32 to vector<1x128xf32>
    %43 = arith.mulf %40, %42 : vector<1x128xf32>
    %44 = vector.extract_strided_slice %5 {offsets = [1, 0], sizes = [1, 128], strides = [1, 1]} : vector<3x128xf32> to vector<1x128xf32>
    %c7 = arith.constant 7 : index
    %45 = memref.load %arg1[%c7] : memref<12xf32, #tpu.memory_space<smem>>
    %46 = vector.broadcast %45 : f32 to vector<1x128xf32>
    %47 = arith.mulf %44, %46 : vector<1x128xf32>
    %48 = arith.addf %43, %47 : vector<1x128xf32>
    %49 = vector.extract_strided_slice %5 {offsets = [2, 0], sizes = [1, 128], strides = [1, 1]} : vector<3x128xf32> to vector<1x128xf32>
    %c8 = arith.constant 8 : index
    %50 = memref.load %arg1[%c8] : memref<12xf32, #tpu.memory_space<smem>>
    %51 = vector.broadcast %50 : f32 to vector<1x128xf32>
    %52 = arith.mulf %49, %51 : vector<1x128xf32>
    %53 = arith.addf %48, %52 : vector<1x128xf32>
    %c11 = arith.constant 11 : index
    %54 = memref.load %arg1[%c11] : memref<12xf32, #tpu.memory_space<smem>>
    %55 = vector.broadcast %54 : f32 to vector<1x128xf32>
    %56 = arith.addf %53, %55 : vector<1x128xf32>
    %57 = tpu.concatenate %22, %39, %56 in 0 : vector<1x128xf32>, vector<1x128xf32>, vector<1x128xf32> -> vector<3x128xf32>
    %cst_3 = arith.constant dense<0.000000e+00> : vector<3xf32>
    %58 = vector.multi_reduction <add>, %57, %cst_3 [1] : vector<3x128xf32> to vector<3xf32>
    %59 = vector.shape_cast %58 : vector<3xf32> to vector<3x1xf32>
    %60 = arith.mulf %57, %57 : vector<3x128xf32>
    %cst_4 = arith.constant dense<0.000000e+00> : vector<3xf32>
    %61 = vector.multi_reduction <add>, %60, %cst_4 [1] : vector<3x128xf32> to vector<3xf32>
    %62 = vector.shape_cast %61 : vector<3xf32> to vector<3x1xf32>
    %c0_5 = arith.constant 0 : index
    %c0_6 = arith.constant 0 : index
    %63 = vector.load %arg3[%c0_5, %c0_6] : memref<6x1xf32, #tpu.memory_space<vmem>>, vector<6x1xf32>
    %64 = tpu.concatenate %59, %62 in 0 : vector<3x1xf32>, vector<3x1xf32> -> vector<6x1xf32>
    %65 = arith.addf %63, %64 : vector<6x1xf32>
    %c0_7 = arith.constant 0 : index
    %c0_8 = arith.constant 0 : index
    %66 = vector.load %arg3[%c0_7, %c0_8] : memref<6x1xf32, #tpu.memory_space<vmem>>, vector<6x1xf32>
    tpu.vector_store %arg3[%c0_7, %c0_8], %65 {strides = array<i32>} : memref<6x1xf32, #tpu.memory_space<vmem>>, vector<6x1xf32>,
    return
  }
  func.func @transform_0(%arg0: i32) -> i32 {
    %c0_i32 = arith.constant 0 : i32
    %c0_i32_0 = arith.constant 0 : i32
    return %c0_i32 : i32
  }
  func.func @transform_1(%arg0: i32) -> (i32, i32) {
    %c0_i32 = arith.constant 0 : i32
    %c0_i32_0 = arith.constant 0 : i32
    return %c0_i32, %arg0 : i32, i32
  }
  func.func @transform_2(%arg0: i32) -> (i32, i32) {
    %c0_i32 = arith.constant 0 : i32
    %c0_i32_0 = arith.constant 0 : i32
    %c0_i32_1 = arith.constant 0 : i32
    return %c0_i32, %c0_i32_0 : i32, i32
  }
}

</mosaic_0001>

<bundles_post_ra>
// kernel: tpu_custom_call.1
= control target key start
LH: loop header
LB: loop body
LE: loop exit
PB: predicated region body
PF: predicated region fallthrough
CT: control target
= control target key end

     0   :  { %7 = vsyncpa [#allocation4], 0  ;;  %s590_s0 = inlined_call_operand.hbm [shape: f32[12], index: 0, kind: input, shape index: {}]   ;;  %s591_s1 = inlined_call_operand.hbm [shape: f32[3,512], index: 1, kind: input, shape index: {}]   ;;  %s592_s2 = inlined_call_operand.vmem [shape: f32[6,1], index: 2, kind: output, shape index: {}]  }
   0x1   :  { %8 = vsyncpa [#allocation3], 0 }
   0x2   :  { %10 = vsyncpa [#allocation3 + $0x1], 0  ;;  %s474_s9 = smov 0   ;;  %s476_s10 = smov 0  }
   0x3   :  { %s478_s11 = smov 0   ;;  %s480_s12 = smov 0  }
   0x4 LB: > { %s303_s13 = sadd.s32 4294967295, %s454_s12   ;;  %p57_p0 = scmp.ne.s32.totalorder %s446_s10, %s442_s9  ;;  %s454_s12 = sphi %s480_s12, %s609_s12   ;;  %s450_s11 = sphi %s478_s11, %s608_s11   ;;  %s446_s10 = sphi %s476_s10, %s607_s10   ;;  %s442_s9 = sphi %s474_s9, %s606_s9  }
   0x5   : > { %p491_p1 = scmp.eq.s32.totalorder %s303_s13, 0  ;;  %p304_p2 = scmp.ge.s32.totalorder %s454_s12, 1 }
   0x6   : > { %p89_p3 = scmp.lt.s32.totalorder %s454_s12, 5  ;;  %p495_p4 = scmp.ne.s32.totalorder %s303_s13, 0 }
   0x7   : > { %s597_s14 = scalar_select %p491_p1, 1, 0 }
   0x8   : > { %s598_s15 = scalar_select %p495_p4, 1, 0 }
   0x9   : > { %p501_p5 = por %p491_p1, %p57_p0  ;;  %p505_p6 = pnand %p304_p2, %p89_p3 }
   0xa   : > { %s509_s18 = sadd.s32 1, %s454_s12   ;;  %s44_s20 = sadd.s32 1, %s450_s11 }
   0xb   : > { %s599_s16 = scalar_select %p501_p5, 1, 0 }
   0xc   : > { %s600_s17 = scalar_select %p505_p6, 1, 0 }
   0xd   : > { %p332_p7 = pneg %p505_p6  ;;  %s41_s19 = ssub.s32 %s454_s12, %s509_s18 }
   0xe   : > { %p42_p9 = scmp.eq.s32.totalorder %s41_s19, 0  ;;  %p51_p10 = scmp.ne.s32.totalorder %s450_s11, %s446_s10 }
   0xf   : > { %p333_p8 = pnand %p332_p7, %p491_p1  ;;  %p52_p11 = scmp.eq.s32.totalorder %s454_s12, 0 }
  0x10   : > { %p341_p12 = scmp.lt.s32.totalorder %s454_s12, 4  ;;  %s456_s21 = smov [#allocation2]  }
  0x11   : > { %335 = dma.hbm_to_smem (!%p333_p8), %s590_s0, 16, %s456_s21, [#allocation4]  }
  0x12   : > { %s523_s24 = scalar_select %p42_p9, %s450_s11, %s44_s20  }
  0x13   : > { %p53_p13 = por %p52_p11, %p51_p10  ;;  %s111_s25 = sand.u32 1, %s450_s11  }
  0x14   : > { %s307_s26 = sshll.u32 %s111_s25, 2  ;;  %s308_s27 = sshll.u32 %s454_s12, 6 }
  0x15   : > { %s529_s30 = scalar_lea.hbm %s591_s1, %s308_s27  ;;  %s115_s3 = scalar_lea.vmem [#allocation5], %s307_s26 }
  0x16   : > { %s122_s4 = sshll.u32 %s115_s3, 4  ;;  %p531_p0 = pnand %p341_p12, %p53_p13  ;;  %s123_s4 = int_to_ptr.vmem [resolvable:$true] %s122_s4 }
  0x17   : > { %s112_s6 = scalar_lea.sflag [#allocation3], %s111_s25  ;;  %s388_s7 = scalar_lea.hbm %s529_s30, 64 }
  0x18   : > { %p389_p2 = scmp.ne.s32.totalorder %s529_s30, %s388_s7  ;;  %p390_p3 = pneg %p531_p0 }
  0x19   : > { %s393_s12 = scalar_lea.hbm %s591_s1, 256  ;;  %p394_p9 = scmp.lt.s32.totalorder %s529_s30, %s591_s1 }
  0x1a   : > { %p391_p7 = pnand %p390_p3, %p389_p2  ;;  %p395_p10 = scmp.lt.s32.totalorder %s393_s12, %s388_s7 }
  0x1c   : > { %p392_p8 = pneg %p391_p7  ;;  %p396_p11 = por %p395_p10, %p394_p9 }
  0x1e   : > { %p397_p12 = pnand %p396_p11, %p392_p8 }
  0x20   : > { %400 = shalt.err (!%p397_p12)
}
  0x21   : > { %s401_s20 = scalar_lea.vmem %s123_s4, 64  ;;  %s457_s21 = smov [#allocation5]  }
  0x22   : > { %p402_p13 = scmp.ne.s32.totalorder %s123_s4, %s401_s20  ;;  %s406_s22 = sshll.u32 %s457_s21, 4  ;;  %s407_s22 = int_to_ptr.vmem [resolvable:$false] %s406_s22 }
  0x23   : > { %s408_s23 = scalar_lea.vmem %s407_s22, 128  ;;  %p409_p2 = scmp.lt.s32.totalorder %s123_s4, %s407_s22 }
  0x24   : > { %p404_p4 = pnand %p402_p13, %p390_p3  ;;  %p410_p7 = scmp.lt.s32.totalorder %s408_s23, %s401_s20 }
  0x26   : > { %p405_p5 = pneg %p404_p4  ;;  %p411_p1 = por %p410_p7, %p409_p2 }
  0x28   : > { %p412_p6 = pnand %p411_p1, %p405_p5 }
  0x2a   : > { %415 = shalt.err (!%p412_p6)
}
  0x2b   : > { %339 = dma.hbm_to_vmem [thread:$0]  (!%p531_p0), %s529_s30, 64, %s123_s4, %s112_s6  }
  0x2c   : > { %p602_p8 = scmp.ne.s32.totalorder %s600_s17, 0 }
  0x2d   : > { %p603_p9 = scmp.ne.s32.totalorder (!%p602_p8), %s597_s14, 0 }
  0x2e   : > { %131 = sbr.rel (%p602_p8) target bundleno = 245 (0xf5), region = 28 }
  0x33   : > { %433 = dma.done.wait (%p603_p9), [#allocation4], 16  }
  0x34   : > { %435 = vsyncadd (%p603_p9), [#allocation4], 4294967280  ;;  %s137_s25 = sand.u32 1, %s446_s10   ;;  %p604_p1 = scmp.ne.s32.totalorder %s599_s16, 0 }
  0x35   : > { %s311_s26 = sshll.u32 %s137_s25, 2  ;;  %s138_s27 = scalar_lea.sflag [#allocation3], %s137_s25 }
  0x36   : > { %s141_s28 = scalar_lea.vmem [#allocation5], %s311_s26 }
  0x37   : > { %437 = dma.done.wait (%p604_p1), %s138_s27, 64  }
  0x38   : > { %439 = vsyncadd (%p604_p1), %s138_s27, 4294967232 }
  0x39   : > { %146 = sfence }
  0x3a   : > { %p605_p4 = scmp.ne.s32.totalorder %s598_s15, 0 }
  0x3c   : > { %161 = sbr.rel (%p605_p4) target bundleno = 67 (0x43), region = 40 }
  0x41   : > { %vm162_vm0 = vcmask 5120   ;;  %v458_v0 = vmov 0.0  }
  0x42   : > { %163 = vst.msk [vmem:[%s592_s2] sm:$0x3f] %vm162_vm0, %v458_v0 }
  0x43 PF: > { %s166_s29 = sld [smem:[#allocation2]]  ;;  %v164_v1 = vld [vmem:[%s141_s28] sm:$0x7]  ;;  %vm232_vm1 = vcmask 1040384   ;;  %vm234_vm2 = vcmask 1041408   ;;  %vm236_vm3 = vcmask 1042432  }
  0x44   : > { %s313_s30 = sld [smem:[#allocation2 + $0x1]]  ;;  %v165_v2 = vmax.f32 %v164_v1, 0.0  ;;  %vm250_vm4 = vcmask 5120  }
  0x45   : > { %s314_s3 = sld [smem:[#allocation2 + $0x2]] }
  0x46   : > { %s565_s4 = sld [smem:[#allocation2 + $0x9]] }
  0x47   : > { %s316_s5 = sld [smem:[#allocation2 + $0x3]] }
  0x48   : > { %s317_s16 = sld [smem:[#allocation2 + $0x4]] }
  0x49   : > { %v167_v3 = vstv %s166_s29  ;;  %s318_s6 = sld [smem:[#allocation2 + $0x5]]  ;;  %v244_v48 = vld [vmem:[%s592_s2] sm:$0x3f] }
  0x4a   : > { %v170_v4 = vstv %s313_s30  ;;  %s567_s15 = sld [smem:[#allocation2 + $0xa]]  ;;  %v168_v7 = vmul.f32 %v167_v3, %v165_v2 }
  0x4b   : > { %v171_v5 = vmul.f32 %v170_v4, %v165_v2  ;;  %v177_v6 = vstv %s314_s3  ;;  %s320_s7 = sld [smem:[#allocation2 + $0x6]] }
  0x4c   : > { %v178_v8 = vmul.f32 %v177_v6, %v165_v2  ;;  %s321_s8 = sld [smem:[#allocation2 + $0x7]]  ;;  %v184_v29 = vstv %s565_s4 }
  0x4d   : > { %v173_v9 = vrot.slane %v171_v5, 1  ;;  %v187_v10 = vstv %s316_s5  ;;  %s322_s9 = sld [smem:[#allocation2 + $0x8]] }
  0x4e   : > { %v190_v11 = vstv %s317_s16  ;;  %v188_v12 = vmul.f32 %v187_v10, %v165_v2  ;;  %v180_v16 = vrot.slane %v178_v8, 2  ;;  %s323_s12 = sld [smem:[#allocation2 + $0xb]] }
  0x4f   : > { %v191_v13 = vmul.f32 %v190_v11, %v165_v2  ;;  %v197_v14 = vstv %s318_s6  ;;  %v175_v15 = vadd.f32 %v173_v9, %v168_v7 }
  0x50   : > { %v198_v17 = vmul.f32 %v197_v14, %v165_v2  ;;  %v204_v27 = vstv %s567_s15 }
  0x51   : > { %v193_v18 = vrot.slane %v191_v13, 1  ;;  %v207_v19 = vstv %s320_s7  ;;  %v182_v26 = vadd.f32 %v180_v16, %v175_v15 }
  0x52   : > { %v200_v20 = vrot.slane %v198_v17, 2  ;;  %v210_v21 = vstv %s321_s8  ;;  %v208_v23 = vmul.f32 %v207_v19, %v165_v2 }
  0x53   : > { %v195_v22 = vadd.f32 %v193_v18, %v188_v12  ;;  %v211_v24 = vmul.f32 %v210_v21, %v165_v2  ;;  %v217_v25 = vstv %s322_s9  ;;  %v185_v35 = vadd.f32 %v184_v29, %v182_v26 }
  0x54   : > { %v218_v28 = vmul.f32 %v217_v25, %v165_v2  ;;  %v224_v36 = vstv %s323_s12 }
  0x55   : > { %v202_v30 = vadd.f32 %v200_v20, %v195_v22  ;;  %v213_v31 = vrot.slane %v211_v24, 1 }
  0x56   : > { %v220_v32 = vrot.slane %v218_v28, 2 }
  0x57   : > { %v205_v33 = vadd.f32 %v204_v27, %v202_v30  ;;  %v215_v34 = vadd.f32 %v213_v31, %v208_v23 }
  0x59   : > { %v222_v37 = vadd.f32 %v220_v32, %v215_v34  ;;  %v227_v38 = vrot.slane %v205_v33, 7 }
  0x5b   : > { %v225_v39 = vadd.f32 %v224_v36, %v222_v37  ;;  %v233_v40 = vsel %vm232_vm1, %v185_v35, %v227_v38 }
  0x5d   : > { %v230_v41 = vrot.slane %v225_v39, 6 }
  0x5f   : > { %v235_v42 = vsel %vm234_vm2, %v233_v40, %v230_v41 }
  0x60   : > { %v240_v43 = vmul.f32 %v235_v42, %v235_v42  ;;  %v237_v45 = vsel %vm236_vm3, %v235_v42, 0.0 }
  0x62   : > { %v241_v44 = vsel %vm236_vm3, %v240_v43, 0.0 }
  0x63   : > { %242 = vadd.xlane.f32.xlu0 %v241_v44 }
  0x67   : > { %238 = vadd.xlane.f32.xlu0 %v237_v45 }
  0xec   : > { %v243_v46 = vpop.xlane.xlu0 %242 }
  0xed   : > { %v246_v47 = vrot.slane %v243_v46, 5 }
  0xf0   : > { %v239_v49 = vpop.xlane.xlu0 %238 }
  0xf1   : > { %v248_v50 = vsel %vm236_vm3, %v239_v49, %v246_v47 }
  0xf2   : > { %v249_v51 = vadd.f32 %v248_v50, %v244_v48 }
  0xf4   : > { %251 = vst.msk [vmem:[%s592_s2] sm:$0x3f] %vm250_vm4, %v249_v51 }
  0xf5 PF: > { %p13_p5 = scmp.ge.s32.totalorder %s509_s18, 6   ;;  %s606_s9 = smov %s446_s10 }
  0xf6   : > { %s607_s10 = smov %s450_s11  ;;  %s608_s11 = smov %s523_s24 }
  0xf7   : > { %s609_s12 = smov %s509_s18  ;;  %15 = sbr.rel (!%p13_p5) target bundleno = 4 (0x4), region = 73 }
  0xfc   :  { %263 = vsyncpa [#allocation3], 1 }
  0xfd   :  { %265 = vsyncpa [#allocation3 + $0x1], 1 }
  0xfe   :  { %266 = vsyncpa [#allocation4], 1 }
  0xff   :  { %268 = vsyncpa [#allocation4 + $0x1], 1 }

</bundles_post_ra>
